<compile_context>
chip_gen: v6e
topology: v6e:2x2x1
jax: 0.10.0
libtpu: 0.0.40
codegen_flags: <defaults>
</compile_context>

<pallas_src>
import functools
import math

import jax
import jax.numpy as jnp
from jax.experimental import pallas as pl
from jax.experimental.pallas import tpu as pltpu


_H_CHUNK = 512  # cap on the live (rows, H) f32 hidden activation inside the kernel


def _vmem_limit(estimate_bytes):
    """Explicit scoped-VMEM limit: >= per-chip defaults, <= v7x physical VMEM."""
    return int(min(64 << 20, max(32 << 20, 2 * int(estimate_bytes))))


# ---------------------------------------------------------------------------
# 1) StableSoftmax as its own kernel (the literal spec module)
# ---------------------------------------------------------------------------
def _row_softmax_kernel(x_ref, out_ref):
    """Softmax over the lane (last) axis of a (tr, cols) block."""
    x = x_ref[...].astype(jnp.float32)
    m = jnp.max(x, axis=-1, keepdims=True)
    p = jnp.exp(x - m)                                    # one EUP exp / element
    denom = jnp.sum(p, axis=-1, keepdims=True)
    out_ref[...] = (p * pl.reciprocal(denom)).astype(out_ref.dtype)


def _packed_row_softmax_kernel(x_ref, out_ref, *, group):
    """Softmax over independent groups of `group` consecutive lanes.

    Each 128-lane row packs 128 // group softmax instances, so loads, compute
    and stores all run at full lane width.  The per-group max / sum
    all-reduces use an XLU roll butterfly (log2(group) steps); a one-off probe
    of pltpu.roll's rotation direction keeps the masks correct on either
    lowering convention.
    """
    x = x_ref[...].astype(jnp.float32)                    # (tr, 128)
    width = x.shape[-1]
    axis = x.ndim - 1
    lane = jax.lax.broadcasted_iota(jnp.int32, x.shape, axis)
    pos = lane & (group - 1)                              # position within group

    probe = pltpu.roll(lane.astype(jnp.float32), shift=1, axis=axis)
    expect = jnp.where(lane == 0, width - 1, lane - 1).astype(jnp.float32)
    fwd = probe == expect                                 # roll(v, s)[j] == v[j - s] ?

    def seg_allreduce(v, op):
        s = 1
        while s < group:                                  # static, unrolled
            a = pltpu.roll(v, shift=s, axis=axis)
            b = pltpu.roll(v, shift=(width - group + s) % width, axis=axis)
            in_group_a = jnp.where(fwd, pos >= s, pos < group - s)
            v = op(v, jnp.where(in_group_a, a, b))
            s *= 2
        return v

    m = seg_allreduce(x, jnp.maximum)                     # per-group max on all lanes
    p = jnp.exp(x - m)                                    # one EUP exp / element
    denom = seg_allreduce(p, jnp.add)                     # per-group sum on all lanes
    out_ref[...] = (p * pl.reciprocal(denom)).astype(out_ref.dtype)


def _col_softmax_kernel(x_ref, out_ref):
    """Softmax over the sublane (middle) axis of a (1, n, tc) block."""
    x = x_ref[...].astype(jnp.float32)
    m = jnp.max(x, axis=1, keepdims=True)
    p = jnp.exp(x - m)
    denom = jnp.sum(p, axis=1, keepdims=True)
    out_ref[...] = (p * pl.reciprocal(denom)).astype(out_ref.dtype)


def _pick_row_tile(rows, cols, requested=None, *, vmem_budget_bytes=8 << 20,
                   min_grid_steps=8, max_rows=1024):
    """Rows per grid step: multiple of 8 sublanes (or the full extent),
    capped so double-buffered in+out tiles fit the VMEM budget, with enough
    grid steps left for the pipeline / both v7x TensorCores."""
    per_row = max(1, cols) * 4 * 4                        # f32 in + out, 2 buffers
    cap = max(8, min(max_rows, vmem_budget_bytes // per_row) // 8 * 8)
    if requested is not None:
        tr = max(1, min(requested, cap))
    else:
        tr = min(512, cap)
        if rows >= min_grid_steps * 256:                  # plenty of work: keep >=8 steps
            tr = min(tr, max(256, pl.cdiv(rows, min_grid_steps) // 8 * 8))
    if rows <= tr:
        return rows                                       # single step, full extent
    tr = max(8, tr - tr % 8)
    return min(tr, pl.cdiv(rows, 8) * 8)


def _pick_col_tile(post, n, requested=None, *, vmem_budget_bytes=8 << 20):
    """Lane tile over the trailing (non-softmax) axis: a multiple of 128, or
    the full axis when it is small."""
    cap = max(128, (vmem_budget_bytes // max(1, n * 4 * 4)) // 128 * 128)
    if requested is None:
        tc = min(512, cap)
    else:
        tc = max(128, min(requested, cap) // 128 * 128)
    if post <= tc or post < 128:
        return post                                       # full extent (always legal)
    return tc


def _plain_row_softmax(x2, block_rows=None):
    rows, cols = x2.shape
    tr = _pick_row_tile(rows, cols, block_rows)
    rows_p = pl.cdiv(rows, tr) * tr
    xp = x2 if rows_p == rows else jnp.pad(x2, ((0, rows_p - rows), (0, 0)))
    out = pl.pallas_call(
        _row_softmax_kernel,
        out_shape=jax.ShapeDtypeStruct((rows_p, cols), x2.dtype),
        grid_spec=pltpu.PrefetchScalarGridSpec(
            num_scalar_prefetch=0,
            grid=(rows_p // tr,),
            in_specs=[pl.BlockSpec((tr, cols), lambda i: (i, 0))],
            out_specs=pl.BlockSpec((tr, cols), lambda i: (i, 0)),
        ),
        compiler_params=pltpu.CompilerParams(
            dimension_semantics=("parallel",),
            vmem_limit_bytes=_vmem_limit(4 * tr * cols * 4)),
    )(xp)
    return out[:rows] if rows_p != rows else out


def _packed_row_softmax(x2, block_rows=None):
    """Small power-of-two softmax axis: pack 128 // cols instances per
    128-lane row (lane-dense DMAs / stores, full VPU+EUP width)."""
    rows, cols = x2.shape
    g = 128 // cols
    pr = pl.cdiv(rows, g)
    tr = _pick_row_tile(pr, 128, block_rows and max(1, block_rows // g))
    pr_p = pl.cdiv(pr, tr) * tr
    rows_p = pr_p * g
    xp = x2 if rows_p == rows else jnp.pad(x2, ((0, rows_p - rows), (0, 0)))
    xp = xp.reshape(pr_p, 128)                            # free: row-major contiguous
    out = pl.pallas_call(
        functools.partial(_packed_row_softmax_kernel, group=cols),
        out_shape=jax.ShapeDtypeStruct((pr_p, 128), x2.dtype),
        grid_spec=pltpu.PrefetchScalarGridSpec(
            num_scalar_prefetch=0,
            grid=(pr_p // tr,),
            in_specs=[pl.BlockSpec((tr, 128), lambda i: (i, 0))],
            out_specs=pl.BlockSpec((tr, 128), lambda i: (i, 0)),
        ),
        compiler_params=pltpu.CompilerParams(
            dimension_semantics=("parallel",),
            vmem_limit_bytes=_vmem_limit(4 * tr * 128 * 4)),
    )(xp)
    return out.reshape(rows_p, cols)[:rows]


def _row_softmax(x2, block_rows=None):
    rows, cols = x2.shape
    if cols == 1:
        return jnp.ones_like(x2)
    packable = 1 < cols < 128 and (cols & (cols - 1)) == 0
    if packable:
        try:
            return _packed_row_softmax(x2, block_rows)
        except Exception:
            pass  # Mosaic build without roll / relayout support: lane-sparse path
    return _plain_row_softmax(x2, block_rows)


def _col_softmax(x3, block_cols=None):
    """Softmax over the middle axis of (pre, n, post): reduction runs over
    sublanes in-kernel, so no HBM transposes (moveaxis) are needed."""
    pre, n, post = x3.shape
    tc = _pick_col_tile(post, n, block_cols)
    post_p = pl.cdiv(post, tc) * tc
    xp = x3 if post_p == post else jnp.pad(
        x3, ((0, 0), (0, 0), (0, post_p - post)))
    out = pl.pallas_call(
        _col_softmax_kernel,
        out_shape=jax.ShapeDtypeStruct((pre, n, post_p), x3.dtype),
        grid_spec=pltpu.PrefetchScalarGridSpec(
            num_scalar_prefetch=0,
            grid=(pre, post_p // tc),
            in_specs=[pl.BlockSpec((1, n, tc), lambda i, j: (i, 0, j))],
            out_specs=pl.BlockSpec((1, n, tc), lambda i, j: (i, 0, j)),
        ),
        compiler_params=pltpu.CompilerParams(
            dimension_semantics=("parallel", "parallel"),
            vmem_limit_bytes=_vmem_limit(4 * n * tc * 4)),
    )(xp)
    return out[:, :, :post] if post_p != post else out


def stable_softmax(x, dim=0, *, block_rows=None):
    """StableSoftmax: LogSoftmax(dim=dim)(x).exp(), as Pallas TPU kernels.

    dim == last axis -> row-softmax kernel (small power-of-two axes are packed
    16-per-128-lane row and reduced with an XLU roll butterfly).
    dim != last axis -> column-softmax kernel reducing over sublanes, avoiding
    any HBM moveaxis/transpose round-trips.
    """
    x = jnp.asarray(x)
    if x.ndim == 0:
        return jnp.ones_like(x)
    dim = dim % x.ndim
    if x.shape[dim] == 1:
        return jnp.ones_like(x)
    n = x.shape[dim]
    pre = math.prod(x.shape[:dim])
    post = math.prod(x.shape[dim + 1:])
    if post == 1:                                          # softmax over the last axis
        out2 = _row_softmax(x.reshape(pre, n), block_rows=block_rows)
        return out2.reshape(x.shape)
    out3 = _col_softmax(x.reshape(pre, n, post))
    return out3.reshape(x.shape)


# ---------------------------------------------------------------------------
# 2) Fused attention head containing StableSoftmax(dim=1)
#    Linear -> BatchNorm1d(eval, folded) -> ReLU -> Dropout(eval) -> Linear ->
#    view(-1, bag) -> StableSoftmax(dim=1) -> unsqueeze(-1)
# ---------------------------------------------------------------------------
def _fused_scores(x_ref, w1_ref, b1_ref, w2_ref, *, h_chunk):
    """Shared body: returns per-row scores (rows, 1) f32.

    H is chunked so the live f32 hidden activation stays <= (rows, h_chunk);
    reducing over lanes before any reshape keeps relayouts on (rows, 1)."""
    x = x_ref[...]                                         # (rows, D) bf16
    hidden = w1_ref.shape[1]
    s_col = None
    for lo in range(0, hidden, h_chunk):                   # static, unrolled
        size = min(h_chunk, hidden - lo)
        h = jnp.dot(x, w1_ref[:, pl.ds(lo, size)],
                    preferred_element_type=jnp.float32)
        h = jnp.maximum(h + b1_ref[:, pl.ds(lo, size)], 0.0)   # ReLU
        # Dropout(0.25) is identity at inference time.
        # TODO(synk): training-mode dropout (pltpu.prng_* mask) not implemented.
        # Linear(H->1) as a VPU multiply + lane reduce (an MXU matmul with N=1
        # would waste the MXU and force a sublane relayout).
        part = jnp.sum(h * w2_ref[:, pl.ds(lo, size)], axis=-1, keepdims=True)
        s_col = part if s_col is None else s_col + part
    return s_col                                           # (rows, 1) f32


def _fused_attention_kernel(x_ref, w1_ref, b1_ref, w2_ref, out_ref, *,
                            block_bags, bag_size, h_chunk):
    rows = block_bags * bag_size
    s = _fused_scores(x_ref, w1_ref, b1_ref, w2_ref, h_chunk=h_chunk)
    # StableSoftmax(dim=1) per bag: one EUP exp / element + EUP reciprocal
    # (replaces the exp/log/exp log-sum-exp epilogue).
    sb = s.reshape(block_bags, bag_size)
    m = jnp.max(sb, axis=-1, keepdims=True)
    p = jnp.exp(sb - m)
    denom = jnp.sum(p, axis=-1, keepdims=True)
    attn = p * pl.reciprocal(denom, approx=True)
    # Lane-dense store: the whole step's scores go out as one (1, rows) row
    # (unmasked vst when rows % 128 == 0) instead of a (bags, bag_size) block.
    out_ref[...] = attn.reshape(1, 1, rows)


def _fused_attention_kernel_compat(x_ref, w1_ref, b1_ref, w2_ref, out_ref, *,
                                   block_bags, bag_size, h_chunk):
    """Fallback with the previously-validated (bags, bag_size) store layout."""
    s = _fused_scores(x_ref, w1_ref, b1_ref, w2_ref, h_chunk=h_chunk)
    sb = s.reshape(block_bags, 1, bag_size).reshape(block_bags, bag_size) \
        if False else s.reshape(block_bags, bag_size)
    m = jnp.max(sb, axis=-1, keepdims=True)
    p = jnp.exp(sb - m)
    denom = jnp.sum(p, axis=-1, keepdims=True)
    out_ref[...] = (p * pl.reciprocal(denom, approx=True))[None]


def _pick_block_bags(batch, bag_size, input_dims, hidden_dim, requested=None,
                     *, h_chunk=_H_CHUNK, vmem_budget_bytes=24 << 20,
                     min_grid_steps=8, max_rows=1024):
    """Bags per grid step.

    (a) feature rows per step are a multiple of 8 sublanes,
    (b) the per-step score row is a multiple of 128 lanes (unmasked stores),
    (c) 2x-buffered tiles + resident weights fit the VMEM budget,
    (d) enough grid steps to feed the pipeline / both v7x TensorCores,
        with <= ~1024 rows per step.
    """
    tb_align = 8 // math.gcd(8, bag_size)                  # (a)
    tb_dense = 128 // math.gcd(128, bag_size)              # (b)
    per_bag = bag_size * (2 * 2 * input_dims               # bf16 features, 2 buffers
                          + 2 * 4                          # f32 scores, 2 buffers
                          + 4 * min(hidden_dim, h_chunk))  # live f32 hidden chunk
    resident = 2 * 2 * input_dims * hidden_dim + 2 * 4 * hidden_dim
    cap = max(tb_align, int((vmem_budget_bytes - resident) // max(per_bag, 1)))
    cap = min(cap, max(tb_align, max_rows // max(bag_size, 1)))          # (c)
    if requested is not None:
        tb = max(1, min(requested, cap))
    else:
        tb = min(cap, max(tb_dense, pl.cdiv(batch, min_grid_steps)))     # (b)+(d)
    if tb >= tb_dense:
        tb -= tb % tb_dense
    tb = max(tb_align, tb - tb % tb_align)
    tb = min(tb, pl.cdiv(batch, tb_align) * tb_align)      # don't over-pad tiny batches
    return max(tb_align, tb)


def _fused_pallas_call(kernel, out_block, out_shape3, x, w1f, b1f, w2f, *,
                       rows, d, hdim, h_chunk, grid_n):
    vmem_est = (2 * rows * d * 2                 # bf16 features, double-buffered
                + 2 * rows * 4                   # f32 scores out, double-buffered
                + 2 * d * hdim * 2               # resident bf16 w1' (2 buffers)
                + 4 * hdim * 4                   # b1', w2'
                + rows * min(hdim, h_chunk) * 4) # live f32 hidden chunk
    cost = pl.CostEstimate(
        flops=2 * grid_n * rows * d * hdim + 4 * grid_n * rows * hdim,
        transcendentals=grid_n * rows + grid_n * rows,
        bytes_accessed=grid_n * rows * d * 2 + d * hdim * 2 + grid_n * rows * 4)
    return pl.pallas_call(
        kernel,
        out_shape=jax.ShapeDtypeStruct(out_shape3, jnp.float32),
        grid_spec=pltpu.PrefetchScalarGridSpec(
            num_scalar_prefetch=0,
            grid=(grid_n,),
            in_specs=[
                # features: streamed / double-buffered over the batch grid.
                # TODO(synk): sweep pipeline_mode=pl.Buffered(3) here when the
                # per-step compute is too short to cover DMA issue latency.
                pl.BlockSpec((rows, d), lambda i: (i, 0)),
                # folded weights: constant index_map -> fetched once, resident.
                # TODO(synk): pipeline_mode=pl.Buffered(1) would single-buffer
                # these (halves their VMEM footprint, matters on v7x); left at
                # the default until verified on the target jax/Mosaic version.
                pl.BlockSpec((d, hdim), lambda i: (0, 0)),
                pl.BlockSpec((1, hdim), lambda i: (0, 0)),
                pl.BlockSpec((1, hdim), lambda i: (0, 0)),
            ],
            out_specs=pl.BlockSpec(out_block, lambda i: (i, 0, 0)),
        ),
        compiler_params=pltpu.CompilerParams(
            dimension_semantics=("parallel",),          # megacore / v7x 2-TC sharding
            vmem_limit_bytes=_vmem_limit(vmem_est)),
        cost_estimate=cost,
    )(x, w1f, b1f, w2f)


def default_attention_module(features, params, bag_size, *, block_bags=None,
                             h_chunk=_H_CHUNK):
    """features: (N, input_dims) f32, N divisible by bag_size.

    Returns attention of shape (N // bag_size, bag_size, 1)."""
    n, d = features.shape
    assert n % bag_size == 0, "N must be divisible by bag_size"
    batch = n // bag_size
    w1, b1, gamma, beta, mean, var, w2, b2 = params
    hdim = w1.shape[1]
    eps = 1e-5

    # Fold BatchNorm1d (eval, running stats) into Linear1; stream features/w1'
    # as bf16 with f32 accumulation (documented accuracy relaxation).  The
    # Linear2 bias b2 is constant within a bag and cancels exactly in the
    # softmax, so it is dropped.
    scale = gamma * jax.lax.rsqrt(var + eps)                # (1, H)
    w1f = (w1 * scale).astype(jnp.bfloat16)                 # (D, H)
    b1f = ((b1 - mean) * scale + beta).astype(jnp.float32)  # (1, H)
    w2f = w2.reshape(1, hdim).astype(jnp.float32)           # (1, H)
    x = features.astype(jnp.bfloat16)
    del b2

    tb = _pick_block_bags(batch, bag_size, d, hdim, block_bags, h_chunk=h_chunk)
    batch_p = pl.cdiv(batch, tb) * tb
    if batch_p != batch:                                    # ragged batch: pad, slice off
        x = jnp.pad(x, ((0, (batch_p - batch) * bag_size), (0, 0)))
    rows = tb * bag_size
    grid_n = batch_p // tb
    call_kw = dict(rows=rows, d=d, hdim=hdim, h_chunk=h_chunk, grid_n=grid_n)

    try:
        # Optimized layout: one lane-dense (1, rows) score row per grid step.
        out = _fused_pallas_call(
            functools.partial(_fused_attention_kernel, block_bags=tb,
                              bag_size=bag_size, h_chunk=h_chunk),
            (1, 1, rows), (grid_n, 1, rows), x, w1f, b1f, w2f, **call_kw)
    except Exception:
        # Mosaic build without the small in-kernel relayout: fall back to the
        # previously-validated (bags, bag_size) store layout.
        out = _fused_pallas_call(
            functools.partial(_fused_attention_kernel_compat, block_bags=tb,
                              bag_size=bag_size, h_chunk=h_chunk),
            (1, tb, bag_size), (grid_n, tb, bag_size), x, w1f, b1f, w2f,
            **call_kw)

    attn = out.reshape(batch_p, bag_size)[:batch]
    return attn[..., None]                                  # (batch, bag, 1)


# ---------------------------------------------------------------------------
# Parameter init + pure-JAX reference (for correctness checking)
# ---------------------------------------------------------------------------
def init_params(key, input_dims, hidden_dim):
    """PyTorch-style init: U(-1/sqrt(fan_in), 1/sqrt(fan_in)); BN defaults."""
    k1, k2, k3, k4 = jax.random.split(key, 4)
    bound1 = 1.0 / (input_dims ** 0.5)
    w1 = jax.random.uniform(k1, (input_dims, hidden_dim), jnp.float32,
                            -bound1, bound1)
    b1 = jax.random.uniform(k2, (1, hidden_dim), jnp.float32, -bound1, bound1)
    bound2 = 1.0 / (hidden_dim ** 0.5)
    w2 = jax.random.uniform(k3, (hidden_dim, 1), jnp.float32, -bound2, bound2)
    b2 = jax.random.uniform(k4, (1, 1), jnp.float32, -bound2, bound2)
    gamma = jnp.ones((1, hidden_dim), jnp.float32)
    beta = jnp.zeros((1, hidden_dim), jnp.float32)
    mean = jnp.zeros((1, hidden_dim), jnp.float32)
    var = jnp.ones((1, hidden_dim), jnp.float32)
    return (w1, b1, gamma, beta, mean, var, w2, b2)


def _reference_attention(features, params, bag_size, eps=1e-5):
    w1, b1, gamma, beta, mean, var, w2, b2 = params
    h = features @ w1 + b1
    h = (h - mean) * jax.lax.rsqrt(var + eps) * gamma + beta
    h = jnp.maximum(h, 0.0)
    s = (h @ w2 + b2).reshape(-1, bag_size)
    return jax.nn.softmax(s, axis=1)[..., None]   # == LogSoftmax(1).exp()


if __name__ == "__main__":
    input_dims = 32
    hidden_dim = 16
    batch = 64
    bag_size = 8
    n = batch * bag_size

    key = jax.random.PRNGKey(0)
    kf, kp, ks, kw, kc = jax.random.split(key, 5)
    features = jax.random.normal(kf, (n, input_dims), jnp.float32)
    params = init_params(kp, input_dims, hidden_dim)

    # --- standalone StableSoftmax kernel (the literal spec module) ---
    scores = jax.random.normal(ks, (batch, bag_size), jnp.float32)
    sm1 = jax.block_until_ready(stable_softmax(scores, dim=1))   # packed row path
    sm0 = jax.block_until_ready(stable_softmax(scores, dim=0))   # column path
    assert bool(jnp.max(jnp.abs(sm1 - jax.nn.softmax(scores, axis=1))) < 1e-5)
    assert bool(jnp.max(jnp.abs(sm0 - jax.nn.softmax(scores, axis=0))) < 1e-5)

    # plain row path (non power-of-two axis, ragged rows -> padding) and a
    # lane-tiled column path
    wide = jax.random.normal(kw, (20, 200), jnp.float32)
    smw = jax.block_until_ready(stable_softmax(wide, dim=1, block_rows=8))
    assert bool(jnp.max(jnp.abs(smw - jax.nn.softmax(wide, axis=1))) < 1e-5)
    cube = jax.random.normal(kc, (2, 6, 1024), jnp.float32)
    smc = jax.block_until_ready(stable_softmax(cube, dim=1))
    assert bool(jnp.max(jnp.abs(smc - jax.nn.softmax(cube, axis=1))) < 1e-5)

    # --- fused attention head ending in StableSoftmax(dim=1) ---
    attention = jax.block_until_ready(
        default_attention_module(features, params, bag_size))
    assert attention.shape == (batch, bag_size, 1)
    ref = _reference_attention(features, params, bag_size)
    # bf16 feature/weight streaming + approximate reciprocal in the epilogue
    assert bool(jnp.max(jnp.abs(attention - ref)) < 1e-2)
    sums = jnp.sum(attention[..., 0], axis=1)
    assert bool(jnp.all(jnp.abs(sums - 1.0) < 5e-3))

    print("KERNEL_OK")
</pallas_src>

<mosaic_0001>
module attributes {stable_mosaic.version = 11 : i64} {
  func.func @_packed_row_softmax_kernel(%arg0: i32, %arg1: memref<4x128xf32, #tpu.memory_space<vmem>>, %arg2: memref<4x128xf32, #tpu.memory_space<vmem>>) attributes {dimension_semantics = [#tpu.dimension_semantics<parallel>], iteration_bounds = array<i64: 1>, scalar_prefetch = 0 : i64, scratch_operands = 0 : i64, tpu.core_type = #tpu.core_type<tc>, window_params = [{transform_indices = @transform_0, window_bounds = array<i64: 4, 128>}, {transform_indices = @transform_1, window_bounds = array<i64: 4, 128>}]} {
    %c0 = arith.constant 0 : index
    %c0_0 = arith.constant 0 : index
    %0 = vector.load %arg1[%c0, %c0_0] : memref<4x128xf32, #tpu.memory_space<vmem>>, vector<4x128xf32>
    %1 = tpu.iota {dimensions = array<i32: 1>} : vector<4x128xi32>
    %c7_i32 = arith.constant 7 : i32
    %2 = vector.broadcast %c7_i32 : i32 to vector<4x128xi32>
    %3 = arith.andi %1, %2 : vector<4x128xi32>
    %4 = arith.sitofp %1 : vector<4x128xi32> to vector<4x128xf32>
    %c1_i32 = arith.constant 1 : i32
    %5 = tpu.dynamic_rotate %4 by %c1_i32 dim 1 : vector<4x128xf32>, i32 -> vector<4x128xf32>
    %c0_i32 = arith.constant 0 : i32
    %6 = vector.broadcast %c0_i32 : i32 to vector<4x128xi32>
    %7 = arith.cmpi eq, %1, %6 : vector<4x128xi32>
    %c1_i32_1 = arith.constant 1 : i32
    %8 = vector.broadcast %c1_i32_1 : i32 to vector<4x128xi32>
    %9 = arith.subi %1, %8 : vector<4x128xi32>
    %c127_i32 = arith.constant 127 : i32
    %10 = vector.broadcast %c127_i32 : i32 to vector<4x128xi32>
    %11 = arith.select %7, %10, %9 : vector<4x128xi1>, vector<4x128xi32>
    %12 = arith.sitofp %11 : vector<4x128xi32> to vector<4x128xf32>
    %13 = arith.cmpf oeq, %5, %12 : vector<4x128xf32>
    %c1_i32_2 = arith.constant 1 : i32
    %14 = tpu.dynamic_rotate %0 by %c1_i32_2 dim 1 : vector<4x128xf32>, i32 -> vector<4x128xf32>
    %c121_i32 = arith.constant 121 : i32
    %15 = tpu.dynamic_rotate %0 by %c121_i32 dim 1 : vector<4x128xf32>, i32 -> vector<4x128xf32>
    %c1_i32_3 = arith.constant 1 : i32
    %16 = vector.broadcast %c1_i32_3 : i32 to vector<4x128xi32>
    %17 = arith.cmpi sge, %3, %16 : vector<4x128xi32>
    %c7_i32_4 = arith.constant 7 : i32
    %18 = vector.broadcast %c7_i32_4 : i32 to vector<4x128xi32>
    %19 = arith.cmpi slt, %3, %18 : vector<4x128xi32>
    %20 = arith.select %13, %17, %19 : vector<4x128xi1>, vector<4x128xi1>
    %21 = arith.select %20, %14, %15 : vector<4x128xi1>, vector<4x128xf32>
    %22 = arith.maximumf %0, %21 : vector<4x128xf32>
    %c2_i32 = arith.constant 2 : i32
    %23 = tpu.dynamic_rotate %22 by %c2_i32 dim 1 : vector<4x128xf32>, i32 -> vector<4x128xf32>
    %c122_i32 = arith.constant 122 : i32
    %24 = tpu.dynamic_rotate %22 by %c122_i32 dim 1 : vector<4x128xf32>, i32 -> vector<4x128xf32>
    %c2_i32_5 = arith.constant 2 : i32
    %25 = vector.broadcast %c2_i32_5 : i32 to vector<4x128xi32>
    %26 = arith.cmpi sge, %3, %25 : vector<4x128xi32>
    %c6_i32 = arith.constant 6 : i32
    %27 = vector.broadcast %c6_i32 : i32 to vector<4x128xi32>
    %28 = arith.cmpi slt, %3, %27 : vector<4x128xi32>
    %29 = arith.select %13, %26, %28 : vector<4x128xi1>, vector<4x128xi1>
    %30 = arith.select %29, %23, %24 : vector<4x128xi1>, vector<4x128xf32>
    %31 = arith.maximumf %22, %30 : vector<4x128xf32>
    %c4_i32 = arith.constant 4 : i32
    %32 = tpu.dynamic_rotate %31 by %c4_i32 dim 1 : vector<4x128xf32>, i32 -> vector<4x128xf32>
    %c124_i32 = arith.constant 124 : i32
    %33 = tpu.dynamic_rotate %31 by %c124_i32 dim 1 : vector<4x128xf32>, i32 -> vector<4x128xf32>
    %c4_i32_6 = arith.constant 4 : i32
    %34 = vector.broadcast %c4_i32_6 : i32 to vector<4x128xi32>
    %35 = arith.cmpi sge, %3, %34 : vector<4x128xi32>
    %c4_i32_7 = arith.constant 4 : i32
    %36 = vector.broadcast %c4_i32_7 : i32 to vector<4x128xi32>
    %37 = arith.cmpi slt, %3, %36 : vector<4x128xi32>
    %38 = arith.select %13, %35, %37 : vector<4x128xi1>, vector<4x128xi1>
    %39 = arith.select %38, %32, %33 : vector<4x128xi1>, vector<4x128xf32>
    %40 = arith.maximumf %31, %39 : vector<4x128xf32>
    %41 = arith.subf %0, %40 : vector<4x128xf32>
    %42 = math.exp %41 : vector<4x128xf32>
    %c1_i32_8 = arith.constant 1 : i32
    %43 = tpu.dynamic_rotate %42 by %c1_i32_8 dim 1 : vector<4x128xf32>, i32 -> vector<4x128xf32>
    %c121_i32_9 = arith.constant 121 : i32
    %44 = tpu.dynamic_rotate %42 by %c121_i32_9 dim 1 : vector<4x128xf32>, i32 -> vector<4x128xf32>
    %c1_i32_10 = arith.constant 1 : i32
    %45 = vector.broadcast %c1_i32_10 : i32 to vector<4x128xi32>
    %46 = arith.cmpi sge, %3, %45 : vector<4x128xi32>
    %c7_i32_11 = arith.constant 7 : i32
    %47 = vector.broadcast %c7_i32_11 : i32 to vector<4x128xi32>
    %48 = arith.cmpi slt, %3, %47 : vector<4x128xi32>
    %49 = arith.select %13, %46, %48 : vector<4x128xi1>, vector<4x128xi1>
    %50 = arith.select %49, %43, %44 : vector<4x128xi1>, vector<4x128xf32>
    %51 = arith.addf %42, %50 : vector<4x128xf32>
    %c2_i32_12 = arith.constant 2 : i32
    %52 = tpu.dynamic_rotate %51 by %c2_i32_12 dim 1 : vector<4x128xf32>, i32 -> vector<4x128xf32>
    %c122_i32_13 = arith.constant 122 : i32
    %53 = tpu.dynamic_rotate %51 by %c122_i32_13 dim 1 : vector<4x128xf32>, i32 -> vector<4x128xf32>
    %c2_i32_14 = arith.constant 2 : i32
    %54 = vector.broadcast %c2_i32_14 : i32 to vector<4x128xi32>
    %55 = arith.cmpi sge, %3, %54 : vector<4x128xi32>
    %c6_i32_15 = arith.constant 6 : i32
    %56 = vector.broadcast %c6_i32_15 : i32 to vector<4x128xi32>
    %57 = arith.cmpi slt, %3, %56 : vector<4x128xi32>
    %58 = arith.select %13, %55, %57 : vector<4x128xi1>, vector<4x128xi1>
    %59 = arith.select %58, %52, %53 : vector<4x128xi1>, vector<4x128xf32>
    %60 = arith.addf %51, %59 : vector<4x128xf32>
    %c4_i32_16 = arith.constant 4 : i32
    %61 = tpu.dynamic_rotate %60 by %c4_i32_16 dim 1 : vector<4x128xf32>, i32 -> vector<4x128xf32>
    %c124_i32_17 = arith.constant 124 : i32
    %62 = tpu.dynamic_rotate %60 by %c124_i32_17 dim 1 : vector<4x128xf32>, i32 -> vector<4x128xf32>
    %c4_i32_18 = arith.constant 4 : i32
    %63 = vector.broadcast %c4_i32_18 : i32 to vector<4x128xi32>
    %64 = arith.cmpi sge, %3, %63 : vector<4x128xi32>
    %c4_i32_19 = arith.constant 4 : i32
    %65 = vector.broadcast %c4_i32_19 : i32 to vector<4x128xi32>
    %66 = arith.cmpi slt, %3, %65 : vector<4x128xi32>
    %67 = arith.select %13, %64, %66 : vector<4x128xi1>, vector<4x128xi1>
    %68 = arith.select %67, %61, %62 : vector<4x128xi1>, vector<4x128xf32>
    %69 = arith.addf %60, %68 : vector<4x128xf32>
    %70 = tpu.reciprocal %69 : vector<4x128xf32> -> vector<4x128xf32>
    %71 = arith.mulf %42, %70 : vector<4x128xf32>
    %c0_20 = arith.constant 0 : index
    %c0_21 = arith.constant 0 : index
    %72 = vector.load %arg2[%c0_20, %c0_21] : memref<4x128xf32, #tpu.memory_space<vmem>>, vector<4x128xf32>
    tpu.vector_store %arg2[%c0_20, %c0_21], %71 {strides = array<i32>} : memref<4x128xf32, #tpu.memory_space<vmem>>, vector<4x128xf32>,
    return
  }
  func.func @transform_0(%arg0: i32) -> (i32, i32) {
    %c0_i32 = arith.constant 0 : i32
    %c0_i32_0 = arith.constant 0 : i32
    return %arg0, %c0_i32 : i32, i32
  }
  func.func @transform_1(%arg0: i32) -> (i32, i32) {
    %c0_i32 = arith.constant 0 : i32
    %c0_i32_0 = arith.constant 0 : i32
    return %arg0, %c0_i32 : i32, i32
  }
}

module attributes {stable_mosaic.version = 11 : i64} {
  func.func @_row_softmax_kernel(%arg0: i32, %arg1: memref<64x8xf32, #tpu.memory_space<vmem>>, %arg2: memref<64x8xf32, #tpu.memory_space<vmem>>) attributes {dimension_semantics = [#tpu.dimension_semantics<parallel>], iteration_bounds = array<i64: 1>, scalar_prefetch = 0 : i64, scratch_operands = 0 : i64, tpu.core_type = #tpu.core_type<tc>, window_params = [{transform_indices = @transform_0, window_bounds = array<i64: 64, 8>}, {transform_indices = @transform_1, window_bounds = array<i64: 64, 8>}]} {
    %c0 = arith.constant 0 : index
    %c0_0 = arith.constant 0 : index
    %0 = vector.load %arg1[%c0, %c0_0] : memref<64x8xf32, #tpu.memory_space<vmem>>, vector<64x8xf32>
    %cst = arith.constant dense<0xFF800000> : vector<64xf32>
    %1 = vector.multi_reduction <maximumf>, %0, %cst [1] : vector<64x8xf32> to vector<64xf32>
    %2 = vector.shape_cast %1 : vector<64xf32> to vector<64x1xf32>
    %3 = vector.broadcast %2 : vector<64x1xf32> to vector<64x8xf32>
    %4 = arith.subf %0, %3 : vector<64x8xf32>
    %5 = math.exp %4 : vector<64x8xf32>
    %cst_1 = arith.constant dense<0.000000e+00> : vector<64xf32>
    %6 = vector.multi_reduction <add>, %5, %cst_1 [1] : vector<64x8xf32> to vector<64xf32>
    %7 = vector.shape_cast %6 : vector<64xf32> to vector<64x1xf32>
    %8 = tpu.reciprocal %7 : vector<64x1xf32> -> vector<64x1xf32>
    %9 = vector.broadcast %8 : vector<64x1xf32> to vector<64x8xf32>
    %10 = arith.mulf %5, %9 : vector<64x8xf32>
    %c0_2 = arith.constant 0 : index
    %c0_3 = arith.constant 0 : index
    %11 = vector.load %arg2[%c0_2, %c0_3] : memref<64x8xf32, #tpu.memory_space<vmem>>, vector<64x8xf32>
    tpu.vector_store %arg2[%c0_2, %c0_3], %10 {strides = array<i32>} : memref<64x8xf32, #tpu.memory_space<vmem>>, vector<64x8xf32>,
    return
  }
  func.func @transform_0(%arg0: i32) -> (i32, i32) {
    %c0_i32 = arith.constant 0 : i32
    %c0_i32_0 = arith.constant 0 : i32
    return %arg0, %c0_i32 : i32, i32
  }
  func.func @transform_1(%arg0: i32) -> (i32, i32) {
    %c0_i32 = arith.constant 0 : i32
    %c0_i32_0 = arith.constant 0 : i32
    return %arg0, %c0_i32 : i32, i32
  }
}

</mosaic_0001>

<bundles_post_ra>
// kernel: tpu_custom_call.1
= control target key start
LH: loop header
LB: loop body
LE: loop exit
PB: predicated region body
PF: predicated region fallthrough
CT: control target
= control target key end

     0   :  { %vm16_vm0 = vcmask 64512   ;;  %s231_s0 = inlined_call_operand.vmem [shape: f32[64,8], index: 0, kind: input, shape index: {}]   ;;  %s232_s1 = inlined_call_operand.vmem [shape: f32[64,8], index: 1, kind: output, shape index: {}]  }
   0x1   :  { %v8_v0 = vld [vmem:[%s231_s0] sm:$0xff]  ;;  %v10_v1 = vld [vmem:[%s231_s0 + $0x10] sm:$0xff]  ;;  %v9_v2 = vld [vmem:[%s231_s0 + $0x8] sm:$0xff] }
   0x2   :  { %v17_v3 = vsel %vm16_vm0, %v8_v0, -inf  ;;  %v23_v4 = vsel %vm16_vm0, %v10_v1, -inf  ;;  %v11_v5 = vld [vmem:[%s231_s0 + $0x18] sm:$0xff]  ;;  %v20_v6 = vsel %vm16_vm0, %v9_v2, -inf  ;;  %v12_v8 = vld [vmem:[%s231_s0 + $0x20] sm:$0xff]  ;;  %v13_v9 = vld [vmem:[%s231_s0 + $0x28] sm:$0xff] }
   0x3   :  { %18 = vmax.xlane.f32.xlu0 %v17_v3  ;;  %24 = vmax.xlane.f32.xlu1 %v23_v4  ;;  %v26_v7 = vsel %vm16_vm0, %v11_v5, -inf  ;;  %v29_v10 = vsel %vm16_vm0, %v12_v8, -inf  ;;  %v32_v11 = vsel %vm16_vm0, %v13_v9, -inf  ;;  %v14_v12 = vld [vmem:[%s231_s0 + $0x30] sm:$0xff]  ;;  %v15_v13 = vld [vmem:[%s231_s0 + $0x38] sm:$0xff] }
   0x4   :  { %v35_v14 = vsel %vm16_vm0, %v14_v12, -inf  ;;  %v38_v15 = vsel %vm16_vm0, %v15_v13, -inf }
   0x7   :  { %21 = vmax.xlane.f32.xlu0 %v20_v6  ;;  %27 = vmax.xlane.f32.xlu1 %v26_v7 }
   0xb   :  { %30 = vmax.xlane.f32.xlu0 %v29_v10  ;;  %33 = vmax.xlane.f32.xlu1 %v32_v11 }
   0xf   :  { %36 = vmax.xlane.f32.xlu0 %v35_v14  ;;  %39 = vmax.xlane.f32.xlu1 %v38_v15 }
  0x8c   :  { %v19_v16 = vpop.xlane.xlu0 %18  ;;  %v25_v17 = vpop.xlane.xlu1 %24 }
  0x8d   :  { %v41_v18 = vsub.f32 %v8_v0, %v19_v16  ;;  %v43_v19 = vsub.f32 %v10_v1, %v25_v17 }
  0x8f   :  { %v49_v20 = vmul.f32 1.442695, %v41_v18  ;;  %v53_v21 = vmul.f32 1.442695, %v43_v19 }
  0x90   :  { %v22_v22 = vpop.xlane.xlu0 %21  ;;  %v28_v23 = vpop.xlane.xlu1 %27 }
  0x91   :  { %117 = vpow2.f32 %v49_v20  ;;  %v42_v24 = vsub.f32 %v9_v2, %v22_v22  ;;  %v44_v25 = vsub.f32 %v11_v5, %v28_v23 }
  0x92   :  { %119 = vpow2.f32 %v53_v21 }
  0x93   :  { %v51_v26 = vmul.f32 1.442695, %v42_v24  ;;  %v55_v27 = vmul.f32 1.442695, %v44_v25 }
  0x94   :  { %v31_v28 = vpop.xlane.xlu0 %30  ;;  %v34_v29 = vpop.xlane.xlu1 %33 }
  0x95   :  { %121 = vpow2.f32 %v51_v26  ;;  %v45_v30 = vsub.f32 %v12_v8, %v31_v28  ;;  %v46_v31 = vsub.f32 %v13_v9, %v34_v29 }
  0x96   :  { %123 = vpow2.f32 %v55_v27 }
  0x97   :  { %v57_v32 = vmul.f32 1.442695, %v45_v30  ;;  %v59_v33 = vmul.f32 1.442695, %v46_v31 }
  0x98   :  { %v37_v34 = vpop.xlane.xlu0 %36  ;;  %v40_v35 = vpop.xlane.xlu1 %39 }
  0x99   :  { %125 = vpow2.f32 %v57_v32  ;;  %v47_v36 = vsub.f32 %v14_v12, %v37_v34  ;;  %v48_v37 = vsub.f32 %v15_v13, %v40_v35 }
  0x9a   :  { %127 = vpow2.f32 %v59_v33 }
  0x9b   :  { %v61_v38 = vmul.f32 1.442695, %v47_v36  ;;  %v63_v39 = vmul.f32 1.442695, %v48_v37 }
  0x9d   :  { %129 = vpow2.f32 %v61_v38 }
  0x9e   :  { %v118_v40 = vpop.eup %117  ;;  %131 = vpow2.f32 %v63_v39 }
  0x9f   :  { %v120_v41 = vpop.eup %119  ;;  %v65_v42 = vsel %vm16_vm0, %v118_v40, 0.0 }
  0xa0   :  { %66 = vadd.xlane.f32.xlu0 %v65_v42  ;;  %v71_v43 = vsel %vm16_vm0, %v120_v41, 0.0 }
  0xa2   :  { %v122_v44 = vpop.eup %121 }
  0xa3   :  { %v124_v45 = vpop.eup %123  ;;  %v68_v46 = vsel %vm16_vm0, %v122_v44, 0.0 }
  0xa4   :  { %72 = vadd.xlane.f32.xlu0 %v71_v43  ;;  %69 = vadd.xlane.f32.xlu1 %v68_v46  ;;  %v74_v47 = vsel %vm16_vm0, %v124_v45, 0.0 }
  0xa6   :  { %v126_v48 = vpop.eup %125 }
  0xa7   :  { %v128_v49 = vpop.eup %127  ;;  %v77_v50 = vsel %vm16_vm0, %v126_v48, 0.0 }
  0xa8   :  { %75 = vadd.xlane.f32.xlu1 %v74_v47  ;;  %78 = vadd.xlane.f32.xlu0 %v77_v50  ;;  %v80_v51 = vsel %vm16_vm0, %v128_v49, 0.0 }
  0xaa   :  { %v130_v52 = vpop.eup %129 }
  0xab   :  { %v132_v53 = vpop.eup %131  ;;  %v83_v54 = vsel %vm16_vm0, %v130_v52, 0.0 }
  0xac   :  { %81 = vadd.xlane.f32.xlu1 %v80_v51  ;;  %84 = vadd.xlane.f32.xlu0 %v83_v54  ;;  %v86_v55 = vsel %vm16_vm0, %v132_v53, 0.0 }
  0xb0   :  { %87 = vadd.xlane.f32.xlu1 %v86_v55 }
 0x129   :  { %v67_v56 = vpop.xlane.xlu0 %66 }
 0x12a   :  { %133 = vrcp.f32 %v67_v56 }
 0x12d   :  { %v70_v57 = vpop.xlane.xlu1 %69  ;;  %v73_v58 = vpop.xlane.xlu0 %72 }
 0x12e   :  { %135 = vrcp.f32 %v70_v57 }
 0x12f   :  { %137 = vrcp.f32 %v73_v58 }
 0x131   :  { %v76_v59 = vpop.xlane.xlu1 %75  ;;  %v79_v60 = vpop.xlane.xlu0 %78 }
 0x132   :  { %139 = vrcp.f32 %v76_v59 }
 0x133   :  { %141 = vrcp.f32 %v79_v60 }
 0x135   :  { %v82_v61 = vpop.xlane.xlu1 %81  ;;  %v85_v62 = vpop.xlane.xlu0 %84 }
 0x136   :  { %143 = vrcp.f32 %v82_v61 }
 0x137   :  { %v134_v63 = vpop.eup %133  ;;  %145 = vrcp.f32 %v85_v62 }
 0x138   :  { %v97_v0 = vmul.f32 %v134_v63, %v118_v40 }
 0x139   :  { %v88_v1 = vpop.xlane.xlu1 %87 }
 0x13a   :  { %105 = vst.msk [vmem:[%s232_s1] sm:$0xff] %vm16_vm0, %v97_v0  ;;  %147 = vrcp.f32 %v88_v1 }
 0x13b   :  { %v136_v2 = vpop.eup %135 }
 0x13c   :  { %v138_v3 = vpop.eup %137  ;;  %v98_v4 = vmul.f32 %v136_v2, %v122_v44 }
 0x13d   :  { %v99_v5 = vmul.f32 %v138_v3, %v120_v41 }
 0x13e   :  { %106 = vst.msk [vmem:[%s232_s1 + $0x8] sm:$0xff] %vm16_vm0, %v98_v4 }
 0x13f   :  { %v140_v6 = vpop.eup %139  ;;  %107 = vst.msk [vmem:[%s232_s1 + $0x10] sm:$0xff] %vm16_vm0, %v99_v5 }
 0x140   :  { %v142_v7 = vpop.eup %141  ;;  %v100_v8 = vmul.f32 %v140_v6, %v124_v45 }
 0x141   :  { %v101_v9 = vmul.f32 %v142_v7, %v126_v48 }
 0x142   :  { %108 = vst.msk [vmem:[%s232_s1 + $0x18] sm:$0xff] %vm16_vm0, %v100_v8 }
 0x143   :  { %v144_v10 = vpop.eup %143  ;;  %109 = vst.msk [vmem:[%s232_s1 + $0x20] sm:$0xff] %vm16_vm0, %v101_v9 }
 0x144   :  { %v146_v11 = vpop.eup %145  ;;  %v102_v12 = vmul.f32 %v144_v10, %v128_v49 }
 0x145   :  { %v103_v13 = vmul.f32 %v146_v11, %v130_v52 }
 0x146   :  { %110 = vst.msk [vmem:[%s232_s1 + $0x28] sm:$0xff] %vm16_vm0, %v102_v12 }
 0x147   :  { %v148_v14 = vpop.eup %147  ;;  %111 = vst.msk [vmem:[%s232_s1 + $0x30] sm:$0xff] %vm16_vm0, %v103_v13 }
 0x148   :  { %v104_v15 = vmul.f32 %v148_v14, %v132_v53 }
 0x14a   :  { %112 = vst.msk [vmem:[%s232_s1 + $0x38] sm:$0xff] %vm16_vm0, %v104_v15 }

</bundles_post_ra>
